<compile_context>
chip_gen: v7x
topology: tpu7x:2x2x1
jax: 0.10.0
libtpu: 0.0.40
codegen_flags: <defaults>
</compile_context>

<pallas_src>
import jax
import jax.numpy as jnp
from jax.experimental import pallas as pl
from jax.experimental.pallas import tpu as pltpu

# ----------------------------- model dims ----------------------------------
IN_DIM = 28 * 28      # 784, flattened MNIST image
HIDDEN = 128
LATENT = 32


def _round_up(n, m):
    return ((n + m - 1) // m) * m


# ------------------------------- kernel ------------------------------------
def autoencoder_kernel(x_ref,
                       we1_ref, be1_ref,
                       wmid_ref, bmid_ref,
                       wd2_ref, bd2_ref,
                       out_ref):
    """Fused Autoencoder forward for one batch tile.

    encoder Linear(784->128)+ReLU, folded latent pair (128->32->128) as one
    128x128 matmul, ReLU, decoder Linear(128->784).  bf16 MXU matmuls with
    f32 accumulation; bias adds / ReLUs in f32.
    """
    x = x_ref[...].astype(jnp.bfloat16)                         # [BM, 784]

    h1 = jnp.dot(x, we1_ref[...], preferred_element_type=jnp.float32)
    h1 = jnp.maximum(h1 + be1_ref[...], 0.0).astype(jnp.bfloat16)   # [BM, 128]

    h2 = jnp.dot(h1, wmid_ref[...], preferred_element_type=jnp.float32)
    h2 = jnp.maximum(h2 + bmid_ref[...], 0.0).astype(jnp.bfloat16)  # [BM, 128]

    y = jnp.dot(h2, wd2_ref[...], preferred_element_type=jnp.float32)
    out_ref[...] = (y + bd2_ref[...]).astype(out_ref.dtype)         # [BM, 784]


# ------------------------------ wrapper -------------------------------------
def _pick_block_b(B, sub):
    """Batch tile heuristic (memory-bound kernel; tiles are dense, never padded
    beyond the sublane multiple):

      * B <= 64 (latency regime): one tile covering the whole batch;
      * otherwise: n_steps = max(2, cdiv(B, 512)) grid steps so v7x's two
        TensorCores both get work, with block_b = round_up(cdiv(B, n_steps), sub)
        capped at 512 rows (tile-size gains saturate ~512 and it keeps VMEM low).
    """
    if B <= 64:
        return _round_up(B, sub)
    n_steps = max(2, pl.cdiv(B, 512))
    return min(512, _round_up(pl.cdiv(B, n_steps), sub))


def autoencoder_forward(x, kparams, *, block_b=None):
    """x: [B, IN_DIM] (f32 or bf16) -> reconstruction [B, IN_DIM] float32."""
    B, D = x.shape
    assert D == IN_DIM
    we1, be1, wmid, bmid, wd2, bd2 = kparams

    # Sublane multiple for the batch tile: (8,128) for f32 x, (16,128) for bf16 x.
    sub = 16 if x.dtype == jnp.bfloat16 else 8
    if block_b is None:
        block_b = _pick_block_b(B, sub)
    block_b = _round_up(block_b, sub)

    # Ragged grid: no wrapper pad / no output slice.  The trailing partial block
    # (if any) has its out-of-range rows masked on store by Pallas.
    grid = (pl.cdiv(B, block_b),)

    def full(arr):
        nd = arr.ndim
        return pl.BlockSpec(arr.shape, lambda i, _nd=nd: (0,) * _nd)

    # Scheduling hint for XLA (mem-bound kernel: ~8 B/elem activations + weights).
    flops = 2 * B * (IN_DIM * HIDDEN + HIDDEN * HIDDEN + HIDDEN * IN_DIM)
    weight_bytes = sum(int(a.size) * a.dtype.itemsize
                       for a in (we1, be1, wmid, bmid, wd2, bd2))
    bytes_accessed = B * IN_DIM * (x.dtype.itemsize + 4) + weight_bytes

    return pl.pallas_call(
        autoencoder_kernel,
        out_shape=jax.ShapeDtypeStruct((B, IN_DIM), jnp.float32),
        grid_spec=pltpu.PrefetchScalarGridSpec(
            num_scalar_prefetch=0,
            grid=grid,
            in_specs=[
                pl.BlockSpec((block_b, IN_DIM), lambda i: (i, 0)),   # x tile
                full(we1), full(be1),
                full(wmid), full(bmid),
                full(wd2), full(bd2),
            ],
            out_specs=pl.BlockSpec((block_b, IN_DIM), lambda i: (i, 0)),
        ),
        compiler_params=pltpu.CompilerParams(
            dimension_semantics=("parallel",),
            # 512-row f32 in/out tiles + temporaries ~10-12 MiB: safely above the
            # working set, but lifts v5e's 16 MiB scoped default out of the way.
            vmem_limit_bytes=64 * 1024 * 1024),
        cost_estimate=pl.CostEstimate(
            flops=flops, transcendentals=0, bytes_accessed=bytes_accessed),
    )(x, we1, be1, wmid, bmid, wd2, bd2)


# --------------------------- parameter handling ------------------------------
def init_params(key):
    """Deterministic synthetic weights (PyTorch Linear-style init, [in,out])."""
    ks = jax.random.split(key, 8)

    def linear(kw, kb, fan_in, fan_out):
        bound = 1.0 / jnp.sqrt(fan_in)
        w = jax.random.uniform(kw, (fan_in, fan_out), jnp.float32, -bound, bound)
        b = jax.random.uniform(kb, (1, fan_out), jnp.float32, -bound, bound)
        return w, b

    we1, be1 = linear(ks[0], ks[1], IN_DIM, HIDDEN)
    we2, be2 = linear(ks[2], ks[3], HIDDEN, LATENT)
    wd1, bd1 = linear(ks[4], ks[5], LATENT, HIDDEN)
    wd2, bd2 = linear(ks[6], ks[7], HIDDEN, IN_DIM)
    return we1, be1, we2, be2, wd1, bd1, wd2, bd2


def prepare_params(raw_params):
    """Fold the latent Linear pair (no nonlinearity between them) and cast the
    weight matrices to bf16 for the MXU.  Biases stay f32.

        W_mid = we2 @ wd1            (f32 fold, then bf16)
        b_mid = be2 @ wd1 + bd1      (f32)
    """
    we1, be1, we2, be2, wd1, bd1, wd2, bd2 = raw_params
    w_mid = we2 @ wd1
    b_mid = be2 @ wd1 + bd1
    return (we1.astype(jnp.bfloat16), be1.astype(jnp.float32),
            w_mid.astype(jnp.bfloat16), b_mid.astype(jnp.float32),
            wd2.astype(jnp.bfloat16), bd2.astype(jnp.float32))


# ------------------------------ references ----------------------------------
def reference_forward(x, kparams):
    """Pure-JAX reference with the same bf16/f32 math as the kernel."""
    we1, be1, wmid, bmid, wd2, bd2 = kparams
    xb = x.astype(jnp.bfloat16)
    h1 = jnp.maximum(
        jnp.dot(xb, we1, preferred_element_type=jnp.float32) + be1, 0.0
    ).astype(jnp.bfloat16)
    h2 = jnp.maximum(
        jnp.dot(h1, wmid, preferred_element_type=jnp.float32) + bmid, 0.0
    ).astype(jnp.bfloat16)
    return jnp.dot(h2, wd2, preferred_element_type=jnp.float32) + bd2


def reference_forward_f32(x, raw_params):
    """Unfolded full-f32 reference (diagnostic only; bf16 changes precision)."""
    we1, be1, we2, be2, wd1, bd1, wd2, bd2 = raw_params
    h1 = jnp.maximum(x @ we1 + be1, 0.0)
    z = h1 @ we2 + be2
    h2 = jnp.maximum(z @ wd1 + bd1, 0.0)
    return h2 @ wd2 + bd2


# --------------------------------- main --------------------------------------
if __name__ == "__main__":
    key = jax.random.PRNGKey(0)
    k_x, k_p, k_x2, k_x3 = jax.random.split(key, 4)

    raw_params = init_params(k_p)
    kparams = prepare_params(raw_params)

    # Small batch (mirrors training_step: flattened 28x28 images -> [B, 784]).
    B = 8
    x = jax.random.normal(k_x, (B, IN_DIM), jnp.float32)
    out = jax.block_until_ready(autoencoder_forward(x, kparams))
    ref = reference_forward(x, kparams)
    assert out.shape == (B, IN_DIM)
    assert jnp.allclose(out, ref, atol=5e-3, rtol=5e-3), "mismatch vs bf16 reference"

    # Larger batch that splits into two *dense* 136-row tiles (no padding,
    # 2 "parallel" grid steps -> both TensorCores on v7x).
    B2 = 272
    x2 = jax.random.normal(k_x2, (B2, IN_DIM), jnp.float32)
    out2 = jax.block_until_ready(autoencoder_forward(x2, kparams))
    ref2 = reference_forward(x2, kparams)
    assert out2.shape == (B2, IN_DIM)
    assert jnp.allclose(out2, ref2, atol=5e-3, rtol=5e-3), "mismatch (multi-tile path)"

    # Ragged batch: block_b does not divide B, exercising the masked trailing block.
    B3 = 100
    x3 = jax.random.normal(k_x3, (B3, IN_DIM), jnp.float32)
    out3 = jax.block_until_ready(autoencoder_forward(x3, kparams))
    ref3 = reference_forward(x3, kparams)
    assert out3.shape == (B3, IN_DIM)
    assert jnp.allclose(out3, ref3, atol=5e-3, rtol=5e-3), "mismatch (ragged path)"

    # Diagnostic only: bf16 + folding vs. the original f32 unfolded math.
    f32_ref = reference_forward_f32(x, raw_params)
    _ = float(jnp.max(jnp.abs(out - f32_ref)))  # expected ~1e-3 level (bf16 rounding)

    print("KERNEL_OK")
</pallas_src>

<mosaic_0001>
module attributes {stable_mosaic.version = 11 : i64} {
  func.func @autoencoder_kernel(%arg0: i32, %arg1: memref<8x784xf32, #tpu.memory_space<vmem>>, %arg2: memref<784x128xbf16, #tpu.memory_space<vmem>>, %arg3: memref<1x128xf32, #tpu.memory_space<vmem>>, %arg4: memref<128x128xbf16, #tpu.memory_space<vmem>>, %arg5: memref<1x128xf32, #tpu.memory_space<vmem>>, %arg6: memref<128x784xbf16, #tpu.memory_space<vmem>>, %arg7: memref<1x784xf32, #tpu.memory_space<vmem>>, %arg8: memref<8x784xf32, #tpu.memory_space<vmem>>) attributes {dimension_semantics = [#tpu.dimension_semantics<parallel>], iteration_bounds = array<i64: 1>, scalar_prefetch = 0 : i64, scratch_operands = 0 : i64, tpu.core_type = #tpu.core_type<tc>, window_params = [{transform_indices = @transform_0, window_bounds = array<i64: 8, 784>}, {pipeline_mode = #tpu.pipeline_mode<synchronous>, transform_indices = @transform_1, window_bounds = array<i64: 784, 128>}, {pipeline_mode = #tpu.pipeline_mode<synchronous>, transform_indices = @transform_2, window_bounds = array<i64: 1, 128>}, {pipeline_mode = #tpu.pipeline_mode<synchronous>, transform_indices = @transform_3, window_bounds = array<i64: 128, 128>}, {pipeline_mode = #tpu.pipeline_mode<synchronous>, transform_indices = @transform_4, window_bounds = array<i64: 1, 128>}, {pipeline_mode = #tpu.pipeline_mode<synchronous>, transform_indices = @transform_5, window_bounds = array<i64: 128, 784>}, {pipeline_mode = #tpu.pipeline_mode<synchronous>, transform_indices = @transform_6, window_bounds = array<i64: 1, 784>}, {transform_indices = @transform_7, window_bounds = array<i64: 8, 784>}]} {
    %c0 = arith.constant 0 : index
    %c0_0 = arith.constant 0 : index
    %0 = vector.load %arg1[%c0, %c0_0] : memref<8x784xf32, #tpu.memory_space<vmem>>, vector<8x784xf32>
    %1 = arith.truncf %0 : vector<8x784xf32> to vector<8x784xbf16>
    %c0_1 = arith.constant 0 : index
    %c0_2 = arith.constant 0 : index
    %2 = vector.load %arg2[%c0_1, %c0_2] : memref<784x128xbf16, #tpu.memory_space<vmem>>, vector<784x128xbf16>
    %cst = arith.constant dense<0.000000e+00> : vector<8x128xf32>
    %3 = tpu.matmul %1, %2, %cst {dimension_numbers = #tpu.dot_dimension_numbers<[1], [0], [0], [1], [0, 0, 1, 1], [], []>} : vector<8x784xbf16>, vector<784x128xbf16>, vector<8x128xf32> -> vector<8x128xf32>
    %c0_3 = arith.constant 0 : index
    %c0_4 = arith.constant 0 : index
    %4 = vector.load %arg3[%c0_3, %c0_4] : memref<1x128xf32, #tpu.memory_space<vmem>>, vector<1x128xf32>
    %5 = vector.broadcast %4 : vector<1x128xf32> to vector<8x128xf32>
    %6 = arith.addf %3, %5 : vector<8x128xf32>
    %cst_5 = arith.constant 0.000000e+00 : f32
    %7 = vector.broadcast %cst_5 : f32 to vector<8x128xf32>
    %8 = arith.maximumf %6, %7 : vector<8x128xf32>
    %9 = arith.truncf %8 : vector<8x128xf32> to vector<8x128xbf16>
    %c0_6 = arith.constant 0 : index
    %c0_7 = arith.constant 0 : index
    %10 = vector.load %arg4[%c0_6, %c0_7] : memref<128x128xbf16, #tpu.memory_space<vmem>>, vector<128x128xbf16>
    %cst_8 = arith.constant dense<0.000000e+00> : vector<8x128xf32>
    %11 = tpu.matmul %9, %10, %cst_8 {dimension_numbers = #tpu.dot_dimension_numbers<[1], [0], [0], [1], [0, 0, 1, 1], [], []>} : vector<8x128xbf16>, vector<128x128xbf16>, vector<8x128xf32> -> vector<8x128xf32>
    %c0_9 = arith.constant 0 : index
    %c0_10 = arith.constant 0 : index
    %12 = vector.load %arg5[%c0_9, %c0_10] : memref<1x128xf32, #tpu.memory_space<vmem>>, vector<1x128xf32>
    %13 = vector.broadcast %12 : vector<1x128xf32> to vector<8x128xf32>
    %14 = arith.addf %11, %13 : vector<8x128xf32>
    %cst_11 = arith.constant 0.000000e+00 : f32
    %15 = vector.broadcast %cst_11 : f32 to vector<8x128xf32>
    %16 = arith.maximumf %14, %15 : vector<8x128xf32>
    %17 = arith.truncf %16 : vector<8x128xf32> to vector<8x128xbf16>
    %c0_12 = arith.constant 0 : index
    %c0_13 = arith.constant 0 : index
    %18 = vector.load %arg6[%c0_12, %c0_13] : memref<128x784xbf16, #tpu.memory_space<vmem>>, vector<128x784xbf16>
    %cst_14 = arith.constant dense<0.000000e+00> : vector<8x784xf32>
    %19 = tpu.matmul %17, %18, %cst_14 {dimension_numbers = #tpu.dot_dimension_numbers<[1], [0], [0], [1], [0, 0, 1, 1], [], []>} : vector<8x128xbf16>, vector<128x784xbf16>, vector<8x784xf32> -> vector<8x784xf32>
    %c0_15 = arith.constant 0 : index
    %c0_16 = arith.constant 0 : index
    %20 = vector.load %arg7[%c0_15, %c0_16] : memref<1x784xf32, #tpu.memory_space<vmem>>, vector<1x784xf32>
    %21 = vector.broadcast %20 : vector<1x784xf32> to vector<8x784xf32>
    %22 = arith.addf %19, %21 : vector<8x784xf32>
    %c0_17 = arith.constant 0 : index
    %c0_18 = arith.constant 0 : index
    %23 = vector.load %arg8[%c0_17, %c0_18] : memref<8x784xf32, #tpu.memory_space<vmem>>, vector<8x784xf32>
    tpu.vector_store %arg8[%c0_17, %c0_18], %22 {strides = array<i32>} : memref<8x784xf32, #tpu.memory_space<vmem>>, vector<8x784xf32>,
    return
  }
  func.func @transform_0(%arg0: i32) -> (i32, i32) {
    %c0_i32 = arith.constant 0 : i32
    %c0_i32_0 = arith.constant 0 : i32
    return %arg0, %c0_i32 : i32, i32
  }
  func.func @transform_1(%arg0: i32) -> (i32, i32) {
    %c0_i32 = arith.constant 0 : i32
    %c0_i32_0 = arith.constant 0 : i32
    %c0_i32_1 = arith.constant 0 : i32
    return %c0_i32, %c0_i32_0 : i32, i32
  }
  func.func @transform_2(%arg0: i32) -> (i32, i32) {
    %c0_i32 = arith.constant 0 : i32
    %c0_i32_0 = arith.constant 0 : i32
    %c0_i32_1 = arith.constant 0 : i32
    return %c0_i32, %c0_i32_0 : i32, i32
  }
  func.func @transform_3(%arg0: i32) -> (i32, i32) {
    %c0_i32 = arith.constant 0 : i32
    %c0_i32_0 = arith.constant 0 : i32
    %c0_i32_1 = arith.constant 0 : i32
    return %c0_i32, %c0_i32_0 : i32, i32
  }
  func.func @transform_4(%arg0: i32) -> (i32, i32) {
    %c0_i32 = arith.constant 0 : i32
    %c0_i32_0 = arith.constant 0 : i32
    %c0_i32_1 = arith.constant 0 : i32
    return %c0_i32, %c0_i32_0 : i32, i32
  }
  func.func @transform_5(%arg0: i32) -> (i32, i32) {
    %c0_i32 = arith.constant 0 : i32
    %c0_i32_0 = arith.constant 0 : i32
    %c0_i32_1 = arith.constant 0 : i32
    return %c0_i32, %c0_i32_0 : i32, i32
  }
  func.func @transform_6(%arg0: i32) -> (i32, i32) {
    %c0_i32 = arith.constant 0 : i32
    %c0_i32_0 = arith.constant 0 : i32
    %c0_i32_1 = arith.constant 0 : i32
    return %c0_i32, %c0_i32_0 : i32, i32
  }
  func.func @transform_7(%arg0: i32) -> (i32, i32) {
    %c0_i32 = arith.constant 0 : i32
    %c0_i32_0 = arith.constant 0 : i32
    return %arg0, %c0_i32 : i32, i32
  }
}

</mosaic_0001>

<bundles_post_ra>
// kernel: tpu_custom_call.1
= control target key start
LH: loop header
LB: loop body
LE: loop exit
PB: predicated region body
PF: predicated region fallthrough
CT: control target
= control target key end

     0   :  { %12 = vsyncpa [#allocation3], 0  ;;  %s2146_s0 = inlined_call_operand.hbm [shape: f32[8,784], index: 0, kind: input, shape index: {}]   ;;  %s2147_s1 = inlined_call_operand.hbm [shape: bf16[784,128], index: 1, kind: input, shape index: {}]   ;;  %s2148_s2 = inlined_call_operand.hbm [shape: f32[1,128], index: 2, kind: input, shape index: {}]   ;;  %s2149_s3 = inlined_call_operand.hbm [shape: bf16[128,128], index: 3, kind: input, shape index: {}]   ;;  %s2150_s4 = inlined_call_operand.hbm [shape: f32[1,128], index: 4, kind: input, shape index: {}]   ;;  %s2151_s5 = inlined_call_operand.hbm [shape: bf16[128,784], index: 5, kind: input, shape index: {}]   ;;  %s2152_s6 = inlined_call_operand.hbm [shape: f32[1,784], index: 6, kind: input, shape index: {}]   ;;  %s2153_s7 = inlined_call_operand.hbm [shape: f32[8,784], index: 7, kind: output, shape index: {}]  }
   0x1   :  { %13 = vsyncpa [#allocation6], 0 }
   0x2   :  { %14 = vsyncpa [#allocation9], 0 }
   0x3   :  { %15 = vsyncpa [#allocation12], 0 }
   0x4   :  { %16 = vsyncpa [#allocation4], 0  ;;  %s1970_s24 = smov [#allocation5]   ;;  %s1784_s28 = scalar_lea.hbm %s2147_s1, 6272 }
   0x5   :  { %s32_s25 = sshll.u32 %s1970_s24, 4  ;;  %p1785_p0 = scmp.ne.s32.totalorder %s2147_s1, %s1784_s28  ;;  %s33_s25 = int_to_ptr.vmem [resolvable:$true] %s32_s25 }
   0x6   :  { %p1788_p1 = scmp.lt.u32.totalorder %s1784_s28, %s2147_s1 }
   0x8   :  { %p1790_p2 = pnand %p1788_p1, %p1785_p0 }
   0xa   :  { %1793 = shalt.err (!%p1790_p2)
}
   0xb   :  { %s1794_s10 = scalar_lea.vmem %s33_s25, 6272  ;;  %p1799_p4 = scmp.lt.s32.totalorder %s33_s25, %s33_s25 }
   0xc   :  { %p1795_p3 = scmp.ne.s32.totalorder %s33_s25, %s1794_s10  ;;  %p1800_p5 = scmp.lt.s32.totalorder %s1794_s10, %s1794_s10 }
   0xe   :  { %p1801_p6 = por %p1800_p5, %p1799_p4 }
  0x10   :  { %p1802_p7 = pnand %p1801_p6, %p1795_p3 }
  0x12   :  { %1805 = shalt.err (!%p1802_p7)
}
  0x13   :  { %s1971_s11 = smov 64   ;;  %s1972_s12 = smov 4  }
  0x14   :  { %38 = dma.hbm_to_vmem [thread:$0]  %s2147_s1, 6272, %s33_s25, [#allocation6], %s1971_s11, %s1971_s11, %s1972_s12  }
  0x15   :  { %s1973_s15 = smov [#allocation8]   ;;  %s1974_s17 = smov [#allocation11]  }
  0x16   :  { %s54_s16 = sshll.u32 %s1973_s15, 4  ;;  %s76_s18 = sshll.u32 %s1974_s17, 4  ;;  %s55_s16 = int_to_ptr.vmem [resolvable:$true] %s54_s16  ;;  %s77_s18 = int_to_ptr.vmem [resolvable:$true] %s76_s18 }
  0x17   :  { %s1806_s21 = scalar_lea.hbm %s2149_s3, 1024 }
  0x18   :  { %p1807_p8 = scmp.ne.s32.totalorder %s2149_s3, %s1806_s21  ;;  %p1810_p9 = scmp.lt.u32.totalorder %s1806_s21, %s2149_s3 }
  0x1a   :  { %p1812_p10 = pnand %p1810_p9, %p1807_p8 }
  0x1c   :  { %1815 = shalt.err (!%p1812_p10)
}
  0x1d   :  { %s1816_s1 = scalar_lea.vmem %s55_s16, 1024  ;;  %p1821_p12 = scmp.lt.s32.totalorder %s55_s16, %s55_s16 }
  0x1e   :  { %p1817_p11 = scmp.ne.s32.totalorder %s55_s16, %s1816_s1  ;;  %p1822_p13 = scmp.lt.s32.totalorder %s1816_s1, %s1816_s1 }
  0x20   :  { %p1823_p0 = por %p1822_p13, %p1821_p12 }
  0x22   :  { %p1824_p1 = pnand %p1823_p0, %p1817_p11 }
  0x24   :  { %1827 = shalt.err (!%p1824_p1)
}
  0x25   :  { %60 = dma.hbm_to_vmem [thread:$0]  %s2149_s3, 1024, %s55_s16, [#allocation9], %s1971_s11, %s1971_s11, %s1972_s12  }
  0x26   :  { %s1828_s30 = scalar_lea.hbm %s2151_s5, 7168 }
  0x27   :  { %p1829_p2 = scmp.ne.s32.totalorder %s2151_s5, %s1828_s30  ;;  %p1832_p3 = scmp.lt.u32.totalorder %s1828_s30, %s2151_s5 }
  0x29   :  { %p1834_p4 = pnand %p1832_p3, %p1829_p2 }
  0x2b   :  { %1837 = shalt.err (!%p1834_p4)
}
  0x2c   :  { %s1838_s14 = scalar_lea.vmem %s77_s18, 7168  ;;  %p1843_p6 = scmp.lt.s32.totalorder %s77_s18, %s77_s18 }
  0x2d   :  { %p1839_p5 = scmp.ne.s32.totalorder %s77_s18, %s1838_s14  ;;  %p1844_p7 = scmp.lt.s32.totalorder %s1838_s14, %s1838_s14 }
  0x2f   :  { %p1845_p8 = por %p1844_p7, %p1843_p6 }
  0x31   :  { %p1846_p9 = pnand %p1845_p8, %p1839_p5 }
  0x33   :  { %1849 = shalt.err (!%p1846_p9)
}
  0x34   :  { %s1975_s3 = smov 448   ;;  %s1976_s11 = smov 28  }
  0x35   :  { %82 = dma.hbm_to_vmem [thread:$0]  %s2151_s5, 7168, %s77_s18, [#allocation12], %s1975_s3, %s1975_s3, %s1976_s11  }
  0x36   :  { %s1977_s16 = smov [#allocation2]   ;;  %s1978_s19 = smov [#allocation7]  }
  0x37   :  { %s23_s17 = sshll.u32 %s1977_s16, 4  ;;  %s45_s20 = sshll.u32 %s1978_s19, 4  ;;  %s24_s17 = int_to_ptr.vmem [resolvable:$true] %s23_s17  ;;  %s46_s20 = int_to_ptr.vmem [resolvable:$true] %s45_s20 }
  0x38   :  { %s1850_s23 = scalar_lea.hbm %s2146_s0, 896 }
  0x39   :  { %p1851_p10 = scmp.ne.s32.totalorder %s2146_s0, %s1850_s23  ;;  %p1854_p11 = scmp.lt.u32.totalorder %s1850_s23, %s2146_s0 }
  0x3b   :  { %p1856_p12 = pnand %p1854_p11, %p1851_p10 }
  0x3d   :  { %1859 = shalt.err (!%p1856_p12)
}
  0x3e   :  { %s1860_s5 = scalar_lea.vmem %s24_s17, 896  ;;  %p1865_p0 = scmp.lt.s32.totalorder %s24_s17, %s24_s17 }
  0x3f   :  { %p1861_p13 = scmp.ne.s32.totalorder %s24_s17, %s1860_s5  ;;  %p1866_p1 = scmp.lt.s32.totalorder %s1860_s5, %s1860_s5 }
  0x41   :  { %p1867_p2 = por %p1866_p1, %p1865_p0 }
  0x43   :  { %p1868_p3 = pnand %p1867_p2, %p1861_p13 }
  0x45   :  { %1871 = shalt.err (!%p1868_p3)
}
  0x46   :  { %26 = dma.hbm_to_vmem [thread:$0]  %s2146_s0, 896, %s24_s17, [#allocation3]  }
  0x47   :  { %s1872_s30 = scalar_lea.hbm %s2148_s2, 16 }
  0x48   :  { %p1873_p4 = scmp.ne.s32.totalorder %s2148_s2, %s1872_s30  ;;  %p1876_p5 = scmp.lt.u32.totalorder %s1872_s30, %s2148_s2 }
  0x4a   :  { %p1878_p6 = pnand %p1876_p5, %p1873_p4 }
  0x4c   :  { %1881 = shalt.err (!%p1878_p6)
}
  0x4d   :  { %s1882_s14 = scalar_lea.vmem %s46_s20, 16  ;;  %s1886_s3 = scalar_lea.vmem %s46_s20, 32 }
  0x4e   :  { %p1883_p7 = scmp.ne.s32.totalorder %s46_s20, %s1882_s14  ;;  %p1887_p8 = scmp.lt.s32.totalorder %s46_s20, %s46_s20 }
  0x4f   :  { %p1888_p9 = scmp.lt.s32.totalorder %s1886_s3, %s1882_s14 }
  0x51   :  { %p1889_p10 = por %p1888_p9, %p1887_p8 }
  0x53   :  { %p1890_p11 = pnand %p1889_p10, %p1883_p7 }
  0x55   :  { %1893 = shalt.err (!%p1890_p11)
}
  0x56   :  { %48 = dma.hbm_to_vmem [thread:$0]  %s2148_s2, 16, %s46_s20, [#allocation6]  }
  0x57   :  { %s1979_s12 = smov [#allocation10]   ;;  %s1980_s16 = smov [#allocation13]  }
  0x58   :  { %s67_s15 = sshll.u32 %s1979_s12, 4  ;;  %s89_s17 = sshll.u32 %s1980_s16, 4  ;;  %s68_s15 = int_to_ptr.vmem [resolvable:$true] %s67_s15  ;;  %s90_s17 = int_to_ptr.vmem [resolvable:$true] %s89_s17 }
  0x59   :  { %s1894_s22 = scalar_lea.hbm %s2150_s4, 16 }
  0x5a   :  { %p1895_p12 = scmp.ne.s32.totalorder %s2150_s4, %s1894_s22  ;;  %p1898_p13 = scmp.lt.u32.totalorder %s1894_s22, %s2150_s4 }
  0x5c   :  { %p1900_p0 = pnand %p1898_p13, %p1895_p12 }
  0x5e   :  { %1903 = shalt.err (!%p1900_p0)
}
  0x5f   :  { %s1904_s2 = scalar_lea.vmem %s68_s15, 16  ;;  %s1908_s20 = scalar_lea.vmem %s68_s15, 32 }
  0x60   :  { %p1905_p1 = scmp.ne.s32.totalorder %s68_s15, %s1904_s2  ;;  %p1909_p2 = scmp.lt.s32.totalorder %s68_s15, %s68_s15 }
  0x61   :  { %p1910_p3 = scmp.lt.s32.totalorder %s1908_s20, %s1904_s2 }
  0x63   :  { %p1911_p4 = por %p1910_p3, %p1909_p2 }
  0x65   :  { %p1912_p5 = pnand %p1911_p4, %p1905_p1 }
  0x67   :  { %1915 = shalt.err (!%p1912_p5)
}
  0x68   :  { %70 = dma.hbm_to_vmem [thread:$0]  %s2150_s4, 16, %s68_s15, [#allocation9]  }
  0x69   :  { %s1916_s28 = scalar_lea.hbm %s2152_s6, 112 }
  0x6a   :  { %p1917_p6 = scmp.ne.s32.totalorder %s2152_s6, %s1916_s28  ;;  %p1920_p7 = scmp.lt.u32.totalorder %s1916_s28, %s2152_s6 }
  0x6c   :  { %p1922_p8 = pnand %p1920_p7, %p1917_p6 }
  0x6e   :  { %1925 = shalt.err (!%p1922_p8)
}
  0x6f   :  { %s1926_s10 = scalar_lea.vmem %s90_s17, 112  ;;  %s1930_s13 = scalar_lea.vmem %s90_s17, 128 }
  0x70   :  { %p1927_p9 = scmp.ne.s32.totalorder %s90_s17, %s1926_s10  ;;  %p1931_p10 = scmp.lt.s32.totalorder %s90_s17, %s90_s17 }
  0x71   :  { %p1932_p11 = scmp.lt.s32.totalorder %s1930_s13, %s1926_s10 }
  0x73   :  { %p1933_p12 = por %p1932_p11, %p1931_p10 }
  0x75   :  { %p1934_p13 = pnand %p1933_p12, %p1927_p9 }
  0x77   :  { %1937 = shalt.err (!%p1934_p13)
}
  0x78   :  { %92 = dma.hbm_to_vmem [thread:$0]  %s2152_s6, 112, %s90_s17, [#allocation12]  }
  0x79   :  { %1960 = dma.done.wait [#allocation3], 896  }
  0x7a   :  { %1961 = vsyncadd [#allocation3], 4294966400 }
  0x7b   :  { %1962 = dma.done.wait [#allocation6], 6288  }
  0x7c   :  { %1963 = vsyncadd [#allocation6], 4294961008 }
  0x7d   :  { %1964 = dma.done.wait [#allocation9], 1040  }
  0x7e   :  { %1965 = vsyncadd [#allocation9], 4294966256 }
  0x7f   :  { %1966 = dma.done.wait [#allocation12], 7280  }
  0x80   :  { %1967 = vsyncadd [#allocation12], 4294960016  ;;  %v1647_v0 = vld [vmem:[#allocation5 + $0x40] sm:$0xff]   ;;  %v1651_v4 = vld [vmem:[#allocation5 + $0x48] sm:$0xff]   ;;  %v1981_v44 = vmov 0.0   ;;  %vm1982_vm0 = vmmov 0  }
  0x81   :  { %v1648_v1 = vld [vmem:[#allocation5] sm:$0xff]   ;;  %1500 = vmatprep.subr.bf16.mxu0 %v1647_v0  ;;  %v1652_v5 = vld [vmem:[#allocation5 + $0x8] sm:$0xff]   ;;  %v1655_v8 = vld [vmem:[#allocation5 + $0x50] sm:$0xff]   ;;  %vm528_vm1 = vcmask 130048   ;;  %s1984_s6 = smov [#allocation14]  }
  0x82   :  { %v1649_v2 = vld [vmem:[#allocation5 + $0xc0] sm:$0xff]   ;;  %1501 = vmatpush3.bf16.msra.mxu0 %v1648_v1  ;;  %v1653_v6 = vld [vmem:[#allocation5 + $0xc8] sm:$0xff]   ;;  %v1656_v9 = vld [vmem:[#allocation5 + $0x10] sm:$0xff]   ;;  %s1372_s3 = sshll.u32 %s1984_s6, 4  ;;  %s1373_s3 = int_to_ptr.vmem [resolvable:$true] %s1372_s3 }
  0x83   :  { %v1650_v3 = vld [vmem:[#allocation5 + $0x80] sm:$0xff]   ;;  %1522 = vmatprep.subr.bf16.mxu1 %v1649_v2  ;;  %1502 = vmatprep.subr.bf16.mxu0 %v1651_v4  ;;  %v1654_v7 = vld [vmem:[#allocation5 + $0x88] sm:$0xff]   ;;  %v1657_v10 = vld [vmem:[#allocation5 + $0xd0] sm:$0xff]   ;;  %s1938_s0 = scalar_lea.vmem %s1373_s3, 896  ;;  %p1943_p1 = scmp.lt.s32.totalorder %s1373_s3, %s1373_s3 }
  0x84   :  { %1523 = vmatpush3.bf16.msra.mxu1 %v1650_v3  ;;  %v1658_v11 = vld [vmem:[#allocation5 + $0x90] sm:$0xff]   ;;  %v1659_v12 = vld [vmem:[#allocation5 + $0x58] sm:$0xff]   ;;  %v1663_v16 = vld [vmem:[#allocation5 + $0x60] sm:$0xff]   ;;  %p1939_p0 = scmp.ne.s32.totalorder %s1373_s3, %s1938_s0  ;;  %p1944_p2 = scmp.lt.s32.totalorder %s1938_s0, %s1938_s0 }
  0x85   :  { %1524 = vmatprep.subr.bf16.mxu1 %v1653_v6  ;;  %v1660_v13 = vld [vmem:[#allocation5 + $0x18] sm:$0xff]   ;;  %v1664_v17 = vld [vmem:[#allocation5 + $0x20] sm:$0xff]   ;;  %v1667_v20 = vld [vmem:[#allocation5 + $0x68] sm:$0xff]  }
  0x86   :  { %1503 = vmatpush3.bf16.msra.mxu0 %v1652_v5  ;;  %v1661_v14 = vld [vmem:[#allocation5 + $0xd8] sm:$0xff]   ;;  %v1665_v18 = vld [vmem:[#allocation5 + $0xe0] sm:$0xff]   ;;  %v1668_v21 = vld [vmem:[#allocation5 + $0x28] sm:$0xff]   ;;  %p1945_p3 = por %p1944_p2, %p1943_p1 }
  0x87   :  { %1504 = vmatprep.subr.bf16.mxu0 %v1655_v8  ;;  %v1662_v15 = vld [vmem:[#allocation5 + $0x98] sm:$0xff]   ;;  %v1666_v19 = vld [vmem:[#allocation5 + $0xa0] sm:$0xff]   ;;  %v1669_v22 = vld [vmem:[#allocation5 + $0xe8] sm:$0xff]  }
  0x88   :  { %1525 = vmatpush3.bf16.msra.mxu1 %v1654_v7  ;;  %v1670_v23 = vld [vmem:[#allocation5 + $0xa8] sm:$0xff]   ;;  %v1671_v24 = vld [vmem:[#allocation5 + $0x70] sm:$0xff]   ;;  %v1675_v28 = vld [vmem:[#allocation5 + $0x78] sm:$0xff]   ;;  %p1946_p4 = pnand %p1945_p3, %p1939_p0 }
  0x89   :  { %1526 = vmatprep.subr.bf16.mxu1 %v1657_v10  ;;  %v1672_v25 = vld [vmem:[#allocation5 + $0x30] sm:$0xff]   ;;  %v1676_v29 = vld [vmem:[#allocation5 + $0x38] sm:$0xff]   ;;  %v115_v34 = vld [vmem:[#allocation2] sm:$0xff] }
  0x8a   :  { %1505 = vmatpush3.bf16.msra.mxu0 %v1656_v9  ;;  %v1673_v26 = vld [vmem:[#allocation5 + $0xf0] sm:$0xff]   ;;  %v1677_v30 = vld [vmem:[#allocation5 + $0xf8] sm:$0xff]   ;;  %v122_v35 = vpack.c.bf16 %v115_v34, %v115_v34  ;;  %v1679_v36 = vld [vmem:[#allocation5 + $0x140] sm:$0xff]  }
  0x8b   :  { %1506 = vmatprep.subr.bf16.mxu0 %v1659_v12  ;;  %v1674_v27 = vld [vmem:[#allocation5 + $0xb0] sm:$0xff]   ;;  %v1678_v33 = vld [vmem:[#allocation5 + $0xb8] sm:$0xff]   ;;  %v118_v37 = vld [vmem:[#allocation2 + $0x18] sm:$0xff] }
  0x8c   :  { %1527 = vmatpush3.bf16.msra.mxu1 %v1658_v11  ;;  %v116_v31 = vld [vmem:[#allocation2 + $0x8] sm:$0xff]  ;;  %v125_v38 = vpack.c.bf16 %v118_v37, %v118_v37  ;;  %v1680_v39 = vld [vmem:[#allocation5 + $0x100] sm:$0xff]   ;;  %v117_v40 = vld [vmem:[#allocation2 + $0x10] sm:$0xff] }
  0x8d   :  { %1528 = vmatprep.subr.bf16.mxu1 %v1661_v14  ;;  %v123_v32 = vpack.c.bf16 %v116_v31, %v116_v31  ;;  %v124_v41 = vpack.c.bf16 %v117_v40, %v117_v40  ;;  %v1681_v42 = vld [vmem:[#allocation5 + $0x148] sm:$0xff]   ;;  %v1683_v45 = vld [vmem:[#allocation5 + $0x150] sm:$0xff]   ;;  %v1685_v47 = vld [vmem:[#allocation5 + $0x158] sm:$0xff]  }
  0x8e   :  { %1507 = vmatpush3.bf16.msra.mxu0 %v1660_v13  ;;  %604 = vmatprep.mubr.bf16.mxu1 %v125_v38  ;;  %v1682_v43 = vld [vmem:[#allocation5 + $0x108] sm:$0xff]   ;;  %v1684_v46 = vld [vmem:[#allocation5 + $0x110] sm:$0xff]   ;;  %v1686_v48 = vld [vmem:[#allocation5 + $0x118] sm:$0xff]  }
  0x8f   :  { %1508 = vmatprep.subr.bf16.mxu0 %v1663_v16  ;;  %564 = vmatprep.mubr.bf16.mxu0 %v123_v32  ;;  %v1687_v49 = vld [vmem:[#allocation5 + $0x160] sm:$0xff]   ;;  %v1689_v51 = vld [vmem:[#allocation5 + $0x168] sm:$0xff]   ;;  %v120_v54 = vld [vmem:[#allocation2 + $0x28] sm:$0xff] }
  0x90   :  { %1529 = vmatpush3.bf16.msra.mxu1 %v1662_v15  ;;  %v1688_v50 = vld [vmem:[#allocation5 + $0x120] sm:$0xff]   ;;  %v1690_v52 = vld [vmem:[#allocation5 + $0x128] sm:$0xff]   ;;  %v1691_v55 = vld [vmem:[#allocation5 + $0x170] sm:$0xff]   ;;  %v127_v56 = vpack.c.bf16 %v120_v54, %v120_v54 }
  0x91   :  { %1530 = vmatprep.subr.bf16.mxu1 %v1665_v18  ;;  %v1695_v53 = vld [vmem:[#allocation5 + $0x180] sm:$0xff]   ;;  %v121_v57 = vld [vmem:[#allocation2 + $0x30] sm:$0xff]  ;;  %v1692_v59 = vld [vmem:[#allocation5 + $0x130] sm:$0xff]  }
  0x92   :  { %1509 = vmatpush3.bf16.msra.mxu0 %v1664_v17  ;;  %v128_v58 = vpack.c.bf16 %v121_v57, %v121_v57  ;;  %v1693_v60 = vld [vmem:[#allocation5 + $0x178] sm:$0xff]   ;;  %v119_v62 = vld [vmem:[#allocation2 + $0x20] sm:$0xff]  ;;  %v1710_v12 = vld [vmem:[#allocation11 + $0x38] ss:$28 sps:$4 sm:$0xff]  }
  0x93   :  { %1510 = vmatprep.subr.bf16.mxu0 %v1667_v20  ;;  %v1694_v61 = vld [vmem:[#allocation5 + $0x138] sm:$0xff]   ;;  %v126_v63 = vpack.c.bf16 %v119_v62, %v119_v62  ;;  %v1696_v0 = vld [vmem:[#allocation8] sm:$0xff]   ;;  %v1699_v3 = vld [vmem:[#allocation8 + $0x18] sm:$0xff]  }
  0x94   :  { %1531 = vmatpush3.bf16.msra.mxu1 %v1666_v19  ;;  %v1697_v1 = vld [vmem:[#allocation8 + $0x8] sm:$0xff]   ;;  %v1698_v2 = vld [vmem:[#allocation8 + $0x10] sm:$0xff]   ;;  %v1700_v4 = vld [vmem:[#allocation8 + $0x20] sm:$0xff]  }
  0x95   :  { %1532 = vmatprep.subr.bf16.mxu1 %v1669_v22  ;;  %v1701_v5 = vld [vmem:[#allocation8 + $0x28] sm:$0xff]   ;;  %v1702_v6 = vld [vmem:[#allocation8 + $0x30] sm:$0xff]   ;;  %v1703_v7 = vld [vmem:[#allocation8 + $0x38] sm:$0xff]  }
  0x96   :  { %1511 = vmatpush3.bf16.msra.mxu0 %v1668_v21  ;;  %v1704_v8 = vld [vmem:[#allocation11] ss:$28 sps:$4 sm:$0xff]   ;;  %v1709_v10 = vld [vmem:[#allocation11 + $0xc] ss:$28 sps:$4 sm:$0xff]   ;;  %v1718_v13 = vld [vmem:[#allocation11 + $0x74] ss:$28 sps:$4 sm:$0xff]  }
  0x97   :  { %1512 = vmatprep.subr.bf16.mxu0 %v1671_v24  ;;  %v1706_v9 = vld [vmem:[#allocation11 + $0x4] ss:$28 sps:$4 sm:$0xff]   ;;  %v1712_v11 = vld [vmem:[#allocation11 + $0x3c] ss:$28 sps:$4 sm:$0xff]   ;;  %v1716_v14 = vld [vmem:[#allocation11 + $0x70] ss:$28 sps:$4 sm:$0xff]  }
  0x98   :  { %1533 = vmatpush3.bf16.msra.mxu1 %v1670_v23  ;;  %v1724_v15 = vld [vmem:[#allocation11 + $0xac] ss:$28 sps:$4 sm:$0xff]   ;;  %v1730_v17 = vld [vmem:[#allocation11 + $0xe4] ss:$28 sps:$4 sm:$0xff]   ;;  %v1736_v19 = vld [vmem:[#allocation11 + $0x11c] ss:$28 sps:$4 sm:$0xff]  }
  0x99   :  { %1534 = vmatprep.subr.bf16.mxu1 %v1673_v26  ;;  %v1722_v16 = vld [vmem:[#allocation11 + $0xa8] ss:$28 sps:$4 sm:$0xff]   ;;  %v1728_v18 = vld [vmem:[#allocation11 + $0xe0] ss:$28 sps:$4 sm:$0xff]   ;;  %v1734_v20 = vld [vmem:[#allocation11 + $0x118] ss:$28 sps:$4 sm:$0xff]  }
  0x9a   :  { %1513 = vmatpush3.bf16.msra.mxu0 %v1672_v25  ;;  %v1742_v21 = vld [vmem:[#allocation11 + $0x154] ss:$28 sps:$4 sm:$0xff]   ;;  %v1384_v24 = vld [vmem:[#allocation7] ss:$0 sm:$0xff]  ;;  %v1733_v57 = vld [vmem:[#allocation11 + $0xec] ss:$28 sps:$4 sm:$0xff]  }
  0x9b   :  { %1514 = vmatprep.subr.bf16.mxu0 %v1675_v28  ;;  %v1740_v22 = vld [vmem:[#allocation11 + $0x150] ss:$28 sps:$4 sm:$0xff]   ;;  %v1719_v54 = vld [vmem:[#allocation11 + $0x78] ss:$28 sps:$4 sm:$0xff]  }
  0x9c   :  { %1535 = vmatpush3.bf16.msra.mxu1 %v1674_v27  ;;  %v1743_v62 = vld [vmem:[#allocation11 + $0x158] ss:$28 sps:$4 sm:$0xff]  }
  0x9d   :  { %1536 = vmatprep.subr.bf16.mxu1 %v1677_v30 }
  0x9e   :  { %1515 = vmatpush3.bf16.msra.mxu0 %v1676_v29 }
  0x9f   :  { %1544 = vmatprep.subr.bf16.mxu0 %v1679_v36 }
  0xa0   :  { %1537 = vmatpush3.bf16.msra.mxu1 %v1678_v33 }
  0xa1   :  { %565 = vmatmul.mubr.bf16.vlgmr.msra.gmra.mrb[0].mxu0 %v122_v35  ;;  %1586 = vmatprep.subr.bf16.mxu1 %v1981_v44 }
  0xa2   :  { %1545 = vmatpush3.bf16.msra.mxu0 %v1680_v39  ;;  %644 = vmatprep.mubr.bf16.mxu0 %v127_v56  ;;  %v1725_v56 = vld [vmem:[#allocation11 + $0xb0] ss:$28 sps:$4 sm:$0xff]  }
  0xa3   :  { %605 = vmatmul.mubr.bf16.vlgmr.msra.gmra.mrb[0].mxu1 %v124_v41  ;;  %1546 = vmatprep.subr.bf16.mxu0 %v1681_v42 }
  0xa4   :  { %1588 = vmatprep.mubr.msk.bf16.mxu1 %vm1982_vm0, %v1981_v44  ;;  %1587 = vmatpush3.bf16.msra.mxu1 %v1695_v53  ;;  %v1721_v53 = vld [vmem:[#allocation11 + $0x7c] ss:$28 sps:$4 sm:$0xff]  }
  0xa5   :  { %1592 = vmatprep.subr.bf16.mxu1 %v1981_v44 }
  0xa6   :  { %1547 = vmatpush3.bf16.msra.mxu0 %v1682_v43 }
  0xa7   :  { %1548 = vmatprep.subr.bf16.mxu0 %v1683_v45 }
  0xaa   :  { %1549 = vmatpush3.bf16.msra.mxu0 %v1684_v46 }
  0xab   :  { %1550 = vmatprep.subr.bf16.mxu0 %v1685_v47  ;;  %1589 = vmatmul.mubr.msk.bf16.vlgmr.msra.gmra.mrb[4].mxu1 %vm528_vm1, %v128_v58  ;;  %v1731_v58 = vld [vmem:[#allocation11 + $0xe8] ss:$28 sps:$4 sm:$0xff]  }
  0xac   :  { %1608 = vmatprep.mubr.msk.bf16.mxu1 %vm1982_vm0, %v1981_v44  ;;  %1593 = vmatpush3.bf16.msra.mxu1 %v1696_v0  ;;  %v1751_v0 = vld [vmem:[#allocation11 + $0x194] ss:$28 sps:$4 sm:$0xff]  }
  0xad   :  { %1594 = vmatprep.subr.bf16.mxu1 %v1981_v44 }
  0xae   :  { %1551 = vmatpush3.bf16.msra.mxu0 %v1686_v48 }
  0xaf   :  { %1552 = vmatprep.subr.bf16.mxu0 %v1687_v49  ;;  %v1707_v49 = vld [vmem:[#allocation11 + $0x8] ss:$28 sps:$4 sm:$0xff]  }
  0xb0   :  { %1595 = vmatpush3.bf16.msra.mxu1 %v1697_v1  ;;  %v1746_v1 = vld [vmem:[#allocation11 + $0x188] ss:$28 sps:$4 sm:$0xff]  }
  0xb1   :  { %1596 = vmatprep.subr.bf16.mxu1 %v1981_v44 }
  0xb2   :  { %1553 = vmatpush3.bf16.msra.mxu0 %v1688_v50 }
  0xb3   :  { %1554 = vmatprep.subr.bf16.mxu0 %v1689_v51  ;;  %v1715_v51 = vld [vmem:[#allocation11 + $0x44] ss:$28 sps:$4 sm:$0xff]  }
  0xb4   :  { %1597 = vmatpush3.bf16.msra.mxu1 %v1698_v2  ;;  %v1749_v2 = vld [vmem:[#allocation11 + $0x190] ss:$28 sps:$4 sm:$0xff]  }
  0xb5   :  { %1598 = vmatprep.subr.bf16.mxu1 %v1981_v44 }
  0xb6   :  { %1555 = vmatpush3.bf16.msra.mxu0 %v1690_v52  ;;  %v1713_v52 = vld [vmem:[#allocation11 + $0x40] ss:$28 sps:$4 sm:$0xff]  }
  0xb7   :  { %1556 = vmatprep.subr.bf16.mxu0 %v1691_v55  ;;  %v1727_v55 = vld [vmem:[#allocation11 + $0xb4] ss:$28 sps:$4 sm:$0xff]  }
  0xb8   :  { %1599 = vmatpush3.bf16.msra.mxu1 %v1699_v3  ;;  %v1754_v3 = vld [vmem:[#allocation11 + $0x14] ss:$28 sps:$4 sm:$0xff]  }
  0xb9   :  { %1600 = vmatprep.subr.bf16.mxu1 %v1981_v44 }
  0xba   :  { %1557 = vmatpush3.bf16.msra.mxu0 %v1692_v59  ;;  %v1739_v59 = vld [vmem:[#allocation11 + $0x124] ss:$28 sps:$4 sm:$0xff]  }
  0xbb   :  { %1558 = vmatprep.subr.bf16.mxu0 %v1693_v60  ;;  %v1737_v60 = vld [vmem:[#allocation11 + $0x120] ss:$28 sps:$4 sm:$0xff]  }
  0xbc   :  { %1601 = vmatpush3.bf16.msra.mxu1 %v1700_v4  ;;  %v1983_v4 = vmov 0  }
  0xbd   :  { %1602 = vmatprep.subr.bf16.mxu1 %v1981_v44 }
  0xbe   :  { %1559 = vmatpush3.bf16.msra.mxu0 %v1694_v61  ;;  %v1745_v61 = vld [vmem:[#allocation11 + $0x15c] ss:$28 sps:$4 sm:$0xff]  }
  0xbf   :  { %1196 = vmatprep.subr.bf16.mxu0 %v1706_v9 }
  0xc0   :  { %1603 = vmatpush3.bf16.msra.mxu1 %v1701_v5  ;;  %v1435_v5 = vld [vmem:[#allocation10] ss:$0 sm:$0xff] }
  0xc1   :  { %645 = vmatmul.mubr.bf16.vlgmr.msra.gmra.mrb[4].mxu0 %v126_v63  ;;  %1604 = vmatprep.subr.bf16.mxu1 %v1981_v44  ;;  %v1748_v63 = vld [vmem:[#allocation11 + $0x18c] ss:$28 sps:$4 sm:$0xff]  }
  0xc2   :  { %1197 = vmatpush1.bf16.msra.mxu0 %v1704_v8  ;;  %1228 = vmatprep.mubr.bf16.mxu0 %v1983_v4 }
  0xc3   :  { %1198 = vmatprep.subr.bf16.mxu0 %v1712_v11 }
  0xc4   :  { %1605 = vmatpush3.bf16.msra.mxu1 %v1702_v6 }
  0xc5   :  { %1606 = vmatprep.subr.bf16.mxu1 %v1981_v44 }
  0xc6   :  { %1199 = vmatpush1.bf16.msra.mxu0 %v1710_v12  ;;  %v1752_v12 = vld [vmem:[#allocation11 + $0x10] ss:$28 sps:$4 sm:$0xff]  }
  0xc7   :  { %1200 = vmatprep.subr.bf16.mxu0 %v1718_v13  ;;  %v1755_v13 = vld [vmem:[#allocation11 + $0x18] ss:$28 sps:$4 sm:$0xff]  }
  0xc8   :  { %1607 = vmatpush3.bf16.msra.mxu1 %v1703_v7 }
  0xc9   :  { %1237 = vmatprep.subr.bf16.mxu1 %v1709_v10 }
  0xca   :  { %1201 = vmatpush1.bf16.msra.mxu0 %v1716_v14 }
  0xcb   :  { %1202 = vmatprep.subr.bf16.mxu0 %v1724_v15  ;;  %v1758_v15 = vld [vmem:[#allocation11 + $0x4c] ss:$28 sps:$4 sm:$0xff]  }
  0xce   :  { %1203 = vmatpush1.bf16.msra.mxu0 %v1722_v16  ;;  %v1756_v16 = vld [vmem:[#allocation11 + $0x48] ss:$28 sps:$4 sm:$0xff]  }
  0xcf   :  { %1204 = vmatprep.subr.bf16.mxu0 %v1730_v17  ;;  %v1759_v17 = vld [vmem:[#allocation11 + $0x50] ss:$28 sps:$4 sm:$0xff]  }
  0xd2   :  { %1205 = vmatpush1.bf16.msra.mxu0 %v1728_v18  ;;  %v1762_v18 = vld [vmem:[#allocation11 + $0x84] ss:$28 sps:$4 sm:$0xff]  }
  0xd3   :  { %1206 = vmatprep.subr.bf16.mxu0 %v1736_v19  ;;  %v1760_v19 = vld [vmem:[#allocation11 + $0x80] ss:$28 sps:$4 sm:$0xff]  }
  0xd6   :  { %1207 = vmatpush1.bf16.msra.mxu0 %v1734_v20  ;;  %v1763_v20 = vld [vmem:[#allocation11 + $0x88] ss:$28 sps:$4 sm:$0xff]  }
  0xd7   :  { %1208 = vmatprep.subr.bf16.mxu0 %v1742_v21  ;;  %v1766_v21 = vld [vmem:[#allocation11 + $0xbc] ss:$28 sps:$4 sm:$0xff]  }
  0xda   :  { %1209 = vmatpush1.bf16.msra.mxu0 %v1740_v22  ;;  %v1764_v22 = vld [vmem:[#allocation11 + $0xb8] ss:$28 sps:$4 sm:$0xff]  }
  0xdb   :  { %1210 = vmatprep.subr.bf16.mxu0 %v1748_v63 }
  0xde   :  { %1211 = vmatpush1.bf16.msra.mxu0 %v1746_v1 }
  0xdf   :  { %1278 = vmatprep.subr.bf16.mxu0 %v1754_v3 }
 0x174   :  { %v1516_v23 = vpop.f32.mrb[0].mxu0 }
 0x175   :  { %v1517_v25 = vpop.f32.mrb[1].mxu0 }
 0x176   :  { %v1518_v26 = vadd.f32 %v1517_v25, %v1516_v23  ;;  %v1519_v27 = vpop.f32.mrb[2].mxu0  ;;  %v1538_v28 = vpop.f32.mrb[0].mxu1  ;;  %v1767_v23 = vld [vmem:[#allocation11 + $0xc0] ss:$28 sps:$4 sm:$0xff]   ;;  %v1768_v25 = vld [vmem:[#allocation11 + $0xf0] ss:$28 sps:$4 sm:$0xff]  }
 0x177   :  { %v1520_v29 = vpop.f32.mrb[3].mxu0  ;;  %v1539_v31 = vpop.f32.mrb[1].mxu1  ;;  %v1774_v27 = vld [vmem:[#allocation11 + $0x12c] ss:$28 sps:$4 sm:$0xff]  }
 0x178   :  { %v567_v30 = vadd.f32 %v1518_v26, %v1384_v24  ;;  %v1540_v32 = vadd.f32 %v1539_v31, %v1538_v28  ;;  %v1541_v33 = vpop.f32.mrb[2].mxu1  ;;  %v1770_v24 = vld [vmem:[#allocation11 + $0xf4] ss:$28 sps:$4 sm:$0xff]   ;;  %v1772_v28 = vld [vmem:[#allocation11 + $0x128] ss:$28 sps:$4 sm:$0xff]  }
 0x179   :  { %v1542_v34 = vpop.f32.mrb[3].mxu1  ;;  %v1771_v26 = vld [vmem:[#allocation11 + $0xf8] ss:$28 sps:$4 sm:$0xff]   ;;  %v1775_v29 = vld [vmem:[#allocation11 + $0x130] ss:$28 sps:$4 sm:$0xff]  }
 0x17a   :  { %v607_v35 = vadd.f32 %v1540_v32, %v567_v30  ;;  %v1778_v30 = vld [vmem:[#allocation11 + $0x164] ss:$28 sps:$4 sm:$0xff]   ;;  %v1782_v33 = vld [vmem:[#allocation11 + $0x19c] ss:$28 sps:$4 sm:$0xff]  }
 0x17b   :  { %v1776_v31 = vld [vmem:[#allocation11 + $0x160] ss:$28 sps:$4 sm:$0xff]   ;;  %v1779_v32 = vld [vmem:[#allocation11 + $0x168] ss:$28 sps:$4 sm:$0xff]   ;;  %v1780_v34 = vld [vmem:[#allocation11 + $0x198] ss:$28 sps:$4 sm:$0xff]  }
 0x17e   :  { %v686_v36 = vpop.f32.mrb[4].mxu1 }
 0x17f   :  { %v1590_v37 = vpop.f32.mrb[5].mxu1 }
 0x180   :  { %v689_v38 = vpop.f32.mrb[6].mxu1 }
 0x181   :  { %v1591_v39 = vpop.f32.mrb[7].mxu1 }
 0x194   :  { %v1560_v40 = vpop.f32.mrb[4].mxu0 }
 0x195   :  { %v1561_v41 = vpop.f32.mrb[5].mxu0 }
 0x196   :  { %v1562_v42 = vadd.f32 %v1561_v41, %v1560_v40  ;;  %v1563_v43 = vpop.f32.mrb[6].mxu0  ;;  %v871_v40 = vld [vmem:[#allocation13] sm:$0x7f] }
 0x197   :  { %v1564_v45 = vpop.f32.mrb[7].mxu0 }
 0x198   :  { %v647_v46 = vadd.f32 %v1562_v42, %v607_v35  ;;  %v1783_v35 = vld [vmem:[#allocation11 + $0x1a0] ss:$28 sps:$4 sm:$0xff]  }
 0x19a   :  { %v687_v47 = vadd.f32 %v686_v36, %v647_v46  ;;  %v873_v36 = vlaneseq }
 0x19c   :  { %v692_v48 = vmax.f32 %v687_v47, 0.0  ;;  %v874_v37 = vshrl.u32 %v873_v36, 7 }
 0x19e   :  { %v693_v50 = vpack.c.bf16 %v692_v48, %v692_v48  ;;  %v875_v38 = vsub.s32 0, %v874_v37  ;;  %v883_v39 = vsub.s32 2, %v874_v37  ;;  %v879_v41 = vsub.s32 1, %v874_v37 }
 0x19f   :  { %v887_v42 = vsub.s32 3, %v874_v37 }
 0x1a0   :  { %1609 = vmatmul.mubr.bf16.vlgmr.msra.gmra.mrb[8].mxu1 %v693_v50  ;;  %v876_v43 = vrot.slane %v871_v40, %v875_v38  ;;  %v884_v45 = vrot.slane %v871_v40, %v883_v39  ;;  %v880_v46 = vrot.slane %v871_v40, %v879_v41 }
 0x1a1   :  { %1238 = vmatpush1.bf16.msra.mxu1 %v1707_v49  ;;  %1269 = vmatprep.mubr.bf16.mxu1 %v1983_v4  ;;  %v888_v47 = vrot.slane %v871_v40, %v887_v42 }
 0x1a2   :  { %1239 = vmatprep.subr.bf16.mxu1 %v1715_v51 }
 0x1a5   :  { %1240 = vmatpush1.bf16.msra.mxu1 %v1713_v52 }
 0x1a6   :  { %1241 = vmatprep.subr.bf16.mxu1 %v1721_v53 }
 0x1a9   :  { %1242 = vmatpush1.bf16.msra.mxu1 %v1719_v54 }
 0x1aa   :  { %1243 = vmatprep.subr.bf16.mxu1 %v1727_v55 }
 0x1ad   :  { %1244 = vmatpush1.bf16.msra.mxu1 %v1725_v56 }
 0x1ae   :  { %1245 = vmatprep.subr.bf16.mxu1 %v1733_v57 }
 0x1b1   :  { %1246 = vmatpush1.bf16.msra.mxu1 %v1731_v58 }
 0x1b2   :  { %1247 = vmatprep.subr.bf16.mxu1 %v1739_v59  ;;  %v891_v59 = vsub.s32 4, %v874_v37 }
 0x1b5   :  { %1248 = vmatpush1.bf16.msra.mxu1 %v1737_v60  ;;  %v899_v60 = vsub.s32 6, %v874_v37 }
 0x1b6   :  { %1249 = vmatprep.subr.bf16.mxu1 %v1745_v61  ;;  %v895_v61 = vsub.s32 5, %v874_v37 }
 0x1b7   :  { %v900_v63 = vrot.slane %v871_v40, %v899_v60 }
 0x1b9   :  { %1250 = vmatpush1.bf16.msra.mxu1 %v1743_v62  ;;  %v892_v62 = vrot.slane %v871_v40, %v891_v59 }
 0x1ba   :  { %1251 = vmatprep.subr.bf16.mxu1 %v1751_v0  ;;  %v896_v0 = vrot.slane %v871_v40, %v895_v61 }
 0x1bd   :  { %1252 = vmatpush1.bf16.msra.mxu1 %v1749_v2 }
 0x1be   :  { %1612 = vmatprep.subr.bf16.mxu1 %v1981_v44 }
 0x273   :  { %v799_v6 = vpop.f32.mrb[8].mxu1 }
 0x274   :  { %v800_v7 = vadd.f32 %v1435_v5, %v799_v6  ;;  %v1610_v8 = vpop.f32.mrb[9].mxu1 }
 0x275   :  { %v802_v9 = vpop.f32.mrb[10].mxu1 }
 0x276   :  { %v805_v10 = vmax.f32 %v800_v7, 0.0  ;;  %v1611_v11 = vpop.f32.mrb[11].mxu1 }
 0x278   :  { %v806_v14 = vpack.c.bf16 %v805_v10, %v805_v10 }
 0x27a   :  { %1229 = vmatmul.mubr.bf16.vlgmr.msra.gmra.mrb[8].mxu0 %v806_v14  ;;  %1270 = vmatmul.mubr.bf16.vlgmr.msra.gmra.mrb[12].mxu1 %v806_v14 }
 0x27b   :  { %1279 = vmatpush1.bf16.msra.mxu0 %v1752_v12  ;;  %1613 = vmatpush3.bf16.msra.mxu1 %v1755_v13 }
 0x27c   :  { %1280 = vmatprep.subr.bf16.mxu0 %v1758_v15  ;;  %1614 = vmatprep.subr.bf16.mxu1 %v1981_v44 }
 0x27d   :  { %1310 = vmatprep.mubr.bf16.mxu0 %v1983_v4  ;;  %1628 = vmatprep.mubr.msk.bf16.mxu1 %vm1982_vm0, %v1981_v44 }
 0x27f   :  { %1281 = vmatpush1.bf16.msra.mxu0 %v1756_v16  ;;  %1615 = vmatpush3.bf16.msra.mxu1 %v1759_v17 }
 0x280   :  { %1282 = vmatprep.subr.bf16.mxu0 %v1762_v18  ;;  %1616 = vmatprep.subr.bf16.mxu1 %v1981_v44 }
 0x283   :  { %1283 = vmatpush1.bf16.msra.mxu0 %v1760_v19  ;;  %1617 = vmatpush3.bf16.msra.mxu1 %v1763_v20 }
 0x284   :  { %1284 = vmatprep.subr.bf16.mxu0 %v1766_v21  ;;  %1618 = vmatprep.subr.bf16.mxu1 %v1981_v44 }
 0x287   :  { %1285 = vmatpush1.bf16.msra.mxu0 %v1764_v22  ;;  %1619 = vmatpush3.bf16.msra.mxu1 %v1767_v23 }
 0x288   :  { %1286 = vmatprep.subr.bf16.mxu0 %v1770_v24  ;;  %1620 = vmatprep.subr.bf16.mxu1 %v1981_v44 }
 0x28b   :  { %1287 = vmatpush1.bf16.msra.mxu0 %v1768_v25  ;;  %1621 = vmatpush3.bf16.msra.mxu1 %v1771_v26 }
 0x28c   :  { %1288 = vmatprep.subr.bf16.mxu0 %v1774_v27  ;;  %1622 = vmatprep.subr.bf16.mxu1 %v1981_v44 }
 0x28f   :  { %1289 = vmatpush1.bf16.msra.mxu0 %v1772_v28  ;;  %1623 = vmatpush3.bf16.msra.mxu1 %v1775_v29 }
 0x290   :  { %1290 = vmatprep.subr.bf16.mxu0 %v1778_v30  ;;  %1624 = vmatprep.subr.bf16.mxu1 %v1981_v44 }
 0x293   :  { %1291 = vmatpush1.bf16.msra.mxu0 %v1776_v31  ;;  %1625 = vmatpush3.bf16.msra.mxu1 %v1779_v32 }
 0x294   :  { %1292 = vmatprep.subr.bf16.mxu0 %v1782_v33  ;;  %1626 = vmatprep.subr.bf16.mxu1 %v1981_v44 }
 0x297   :  { %1293 = vmatpush1.bf16.msra.mxu0 %v1780_v34  ;;  %1627 = vmatpush3.bf16.msra.mxu1 %v1783_v35 }
 0x29a   :  { %1311 = vmatmul.mubr.bf16.vlgmr.msra.gmra.mrb[12].mxu0 %v806_v14  ;;  %1629 = vmatmul.mubr.bf16.vlgmr.msra.gmra.mrb[16].mxu1 %v806_v14 }
 0x34d   :  { %v1230_v48 = vpop.f32.mrb[8].mxu0  ;;  %v1271_v49 = vpop.f32.mrb[12].mxu1 }
 0x34e   :  { %v1231_v50 = vadd.f32 %v1230_v48, %v876_v43  ;;  %v1272_v51 = vadd.f32 %v1271_v49, %v884_v45  ;;  %v1232_v44 = vpop.f32.mrb[9].mxu0  ;;  %v1273_v52 = vpop.f32.mrb[13].mxu1 }
 0x34f   :  { %v1233_v53 = vadd.f32 %v1232_v44, %v880_v46  ;;  %v1274_v54 = vadd.f32 %v1273_v52, %v888_v47  ;;  %v1234_v55 = vpop.f32.mrb[10].mxu0  ;;  %v1275_v56 = vpop.f32.mrb[14].mxu1 }
 0x350   :  { %1359 = vst [vmem:[#allocation14] sm:$0xff] %v1231_v50  ;;  %1361 = vst [vmem:[#allocation14 + $0x10] sm:$0xff] %v1272_v51  ;;  %v1235_v57 = vpop.f32.mrb[11].mxu0  ;;  %v1276_v58 = vpop.f32.mrb[15].mxu1 }
 0x351   :  { %1360 = vst [vmem:[#allocation14 + $0x8] sm:$0xff] %v1233_v53  ;;  %1362 = vst [vmem:[#allocation14 + $0x18] sm:$0xff] %v1274_v54 }
 0x36d   :  { %v1312_v1 = vpop.f32.mrb[12].mxu0  ;;  %v1353_v2 = vpop.f32.mrb[16].mxu1 }
 0x36e   :  { %v1313_v3 = vadd.f32 %v1312_v1, %v892_v62  ;;  %v1354_v4 = vadd.f32 %v1353_v2, %v900_v63  ;;  %v1314_v5 = vpop.f32.mrb[13].mxu0  ;;  %v1630_v6 = vpop.f32.mrb[17].mxu1 }
 0x36f   :  { %v1315_v7 = vadd.f32 %v1314_v5, %v896_v0  ;;  %v1316_v8 = vpop.f32.mrb[14].mxu0  ;;  %v1356_v9 = vpop.f32.mrb[18].mxu1 }
 0x370   :  { %1363 = vst [vmem:[#allocation14 + $0x20] sm:$0xff] %v1313_v3  ;;  %1365 = vst.msk [vmem:[#allocation14 + $0x30] sm:$0xff] %vm528_vm1, %v1354_v4  ;;  %v1317_v10 = vpop.f32.mrb[15].mxu0  ;;  %v1631_v11 = vpop.f32.mrb[19].mxu1 }
 0x371   :  { %1364 = vst [vmem:[#allocation14 + $0x28] sm:$0xff] %v1315_v7 }
 0x372   :  { %1949 = shalt.err (!%p1946_p4)
}
 0x373   :  { %s1950_s15 = scalar_lea.hbm %s2153_s7, 896 }
 0x374   :  { %p1951_p5 = scmp.ne.s32.totalorder %s2153_s7, %s1950_s15  ;;  %p1954_p6 = scmp.lt.u32.totalorder %s1950_s15, %s2153_s7 }
 0x376   :  { %p1956_p7 = pnand %p1954_p6, %p1951_p5 }
 0x378   :  { %1959 = shalt.err (!%p1956_p7)
}
 0x379   :  { %1375 = dma.vmem_to_hbm [thread:$0]  %s1373_s3, 896, %s2153_s7, [#allocation4]  }
 0x37a   :  { %1968 = dma.done.wait [#allocation4], 896  }
 0x37b   :  { %1969 = vsyncadd [#allocation4], 4294966400 }
 0x37c   :  { %1379 = vsyncpa [#allocation3], 1 }
 0x37d   :  { %1380 = vsyncpa [#allocation6], 1 }
 0x37e   :  { %1381 = vsyncpa [#allocation9], 1 }
 0x37f   :  { %1382 = vsyncpa [#allocation12], 1 }
 0x380   :  { %1383 = vsyncpa [#allocation4], 1 }

</bundles_post_ra>
